<compile_context>
chip_gen: v5e
topology: v5e:2x2
jax: 0.10.0
libtpu: 0.0.40
codegen_flags: <defaults>
</compile_context>

<pallas_src>
import jax
import jax.numpy as jnp
from jax.experimental import pallas as pl
from jax.experimental.pallas import tpu as pltpu


def _round_up(v, m):
    return ((v + m - 1) // m) * m


def _pick_tile(dim_min, candidates):
    """Largest candidate tile whose round-up padding wastes <= 12.5% of dim_min."""
    if dim_min <= candidates[0]:
        return dim_min
    for cand in candidates:
        pad = _round_up(dim_min, cand) - dim_min
        if pad * 8 <= dim_min:
            return cand
    return candidates[-1]


# ----------------------------------------------------------------------------
# Fast path: in_features == out_features == 1  ->  y = x * w + b  (pure VPU)
# ----------------------------------------------------------------------------
def _scale_shift_kernel(w_ref, b_ref, x_ref, o_ref):
    # w_ref, b_ref: (1, 1) scalars in SMEM; x_ref, o_ref: (tile_rows, 128) VMEM.
    w = w_ref[0, 0]
    b = b_ref[0, 0]
    o_ref[...] = (x_ref[...] * w + b).astype(o_ref.dtype)


def _linear_1x1(x, weight, bias):
    # TODO(synk): for tiny m (e.g. the shipped m=8 workload) a plain jnp
    # x*w+b is strictly cheaper than any kernel dispatch; kept on the Pallas
    # path here so the kernel itself is exercised end-to-end.
    m = x.shape[0]
    dtype = x.dtype
    lanes, sub = 128, 8

    flat = x.reshape(-1)  # (m,) since in_features == 1
    rows = max(sub, _round_up(pl.cdiv(m, lanes), sub))

    # Tile selection: one block when it fits comfortably in VMEM, otherwise the
    # largest tile with bounded padding waste (fixes rows=520 -> 1024 blow-up).
    if rows <= 1024:
        tile_rows = rows
    else:
        tile_rows = _pick_tile(rows, (1024, 512, 256, 128, 64, 32, 16, 8))

    rows_p = _round_up(rows, tile_rows)
    padded = rows_p * lanes
    if padded != m:
        flat = jnp.pad(flat, (0, padded - m))
    x2d = flat.reshape(rows_p, lanes)  # lane-dense view of x

    w2d = weight.reshape(1, 1)
    b2d = bias.reshape(1, 1)

    out2d = pl.pallas_call(
        _scale_shift_kernel,
        out_shape=jax.ShapeDtypeStruct((rows_p, lanes), dtype),
        grid=(rows_p // tile_rows,),
        in_specs=[
            pl.BlockSpec(memory_space=pltpu.MemorySpace.SMEM),
            pl.BlockSpec(memory_space=pltpu.MemorySpace.SMEM),
            pl.BlockSpec((tile_rows, lanes), lambda i: (i, 0)),
        ],
        out_specs=pl.BlockSpec((tile_rows, lanes), lambda i: (i, 0)),
        compiler_params=pltpu.CompilerParams(
            dimension_semantics=("parallel",),
        ),
    )(w2d, b2d, x2d)

    return out2d.reshape(-1)[:m].reshape(m, 1)


# ----------------------------------------------------------------------------
# General tiled path: y[M, OUT] = x[M, IN] @ W[OUT, IN]^T + b[OUT]
# W is pre-transposed in the wrapper to Wt[IN, OUT] so the kernel contracts
# (tm, tk) x (tk, tn) directly on the MXU with no in-loop transpose.
# ----------------------------------------------------------------------------
def _linear_kernel_single_k(x_ref, w_ref, b_ref, o_ref):
    # K fits in a single tile: no accumulator, no zero-init, single store pass.
    o_ref[...] = (
        jnp.dot(x_ref[...], w_ref[...], preferred_element_type=jnp.float32)
        + b_ref[...]
    ).astype(o_ref.dtype)


def _linear_kernel_acc(x_ref, w_ref, b_ref, o_ref, acc_ref):
    k = pl.program_id(2)

    @pl.when(k == 0)
    def _():
        acc_ref[...] = jnp.zeros_like(acc_ref)

    acc_ref[...] += jnp.dot(
        x_ref[...], w_ref[...], preferred_element_type=jnp.float32
    )

    @pl.when(k == pl.num_programs(2) - 1)
    def _():
        o_ref[...] = (acc_ref[...] + b_ref[...]).astype(o_ref.dtype)


def _linear_general(x, weight, bias):
    m, kdim = x.shape
    n = weight.shape[0]
    dtype = x.dtype

    # Hardware-aligned minimal padded extents.
    mp_min = _round_up(m, 8)
    np_min = _round_up(n, 128)
    kp_min = _round_up(kdim, 128)

    # Shape-derived tiles: zero extra padding when the dim fits in one tile,
    # otherwise <=12.5% padding waste per axis.
    tm = mp_min if mp_min <= 512 else _pick_tile(mp_min, (512, 256, 128, 64, 32, 16, 8))
    tn = np_min if np_min <= 512 else _pick_tile(np_min, (512, 256, 128))
    tk = kp_min if kp_min <= 512 else _pick_tile(kp_min, (512, 256, 128))

    mp = _round_up(mp_min, tm)
    np_ = _round_up(np_min, tn)
    kp = _round_up(kp_min, tk)

    # v7x megacore: a 1x1 parallel grid idles one TensorCore; split M into two
    # tiles when possible (costs at most one extra grid step elsewhere).
    if (mp // tm) * (np_ // tn) < 2 and mp_min >= 16:
        tm = _round_up(pl.cdiv(mp_min, 2), 8)
        mp = 2 * tm

    xp = jnp.pad(x, ((0, mp - m), (0, kp - kdim)))
    # One-time wrapper transpose: W[OUT, IN] -> Wt[IN, OUT], amortized over all
    # M tiles; the K loop then never touches the XLU.
    wt = jnp.pad(weight.T, ((0, kp - kdim), (0, np_ - n)))
    bp = jnp.pad(bias, (0, np_ - n)).reshape(1, np_)

    nk = kp // tk
    if nk == 1:
        out = pl.pallas_call(
            _linear_kernel_single_k,
            out_shape=jax.ShapeDtypeStruct((mp, np_), dtype),
            grid=(mp // tm, np_ // tn),
            in_specs=[
                pl.BlockSpec((tm, kp), lambda i, j: (i, 0)),
                pl.BlockSpec((kp, tn), lambda i, j: (0, j)),
                pl.BlockSpec((1, tn), lambda i, j: (0, j)),
            ],
            out_specs=pl.BlockSpec((tm, tn), lambda i, j: (i, j)),
            compiler_params=pltpu.CompilerParams(
                dimension_semantics=("parallel", "parallel"),
            ),
        )(xp, wt, bp)
    else:
        out = pl.pallas_call(
            _linear_kernel_acc,
            out_shape=jax.ShapeDtypeStruct((mp, np_), dtype),
            grid=(mp // tm, np_ // tn, nk),
            in_specs=[
                pl.BlockSpec((tm, tk), lambda i, j, kk: (i, kk)),
                pl.BlockSpec((tk, tn), lambda i, j, kk: (kk, j)),
                pl.BlockSpec((1, tn), lambda i, j, kk: (0, j)),
            ],
            out_specs=pl.BlockSpec((tm, tn), lambda i, j, kk: (i, j)),
            scratch_shapes=[pltpu.VMEM((tm, tn), jnp.float32)],
            compiler_params=pltpu.CompilerParams(
                dimension_semantics=("parallel", "parallel", "arbitrary"),
            ),
        )(xp, wt, bp)

    return out[:m, :n]


def linear_forward(x, weight, bias):
    out_f, in_f = weight.shape
    if in_f == 1 and out_f == 1:
        return _linear_1x1(x, weight, bias)
    return _linear_general(x, weight, bias)


if __name__ == "__main__":
    key = jax.random.PRNGKey(0)
    kx, kw, kb, kx2, kw2, kb2, kx3, kw3, kb3 = jax.random.split(key, 9)

    # Model: nn.Linear(1, 1) -> weight (1, 1), bias (1,)
    weight = jax.random.uniform(kw, (1, 1), jnp.float32, minval=-1.0, maxval=1.0)
    bias = jax.random.uniform(kb, (1,), jnp.float32, minval=-1.0, maxval=1.0)
    x = jax.random.normal(kx, (8, 1), jnp.float32)

    y = linear_forward(x, weight, bias)
    jax.block_until_ready(y)
    y_ref = x @ weight.T + bias
    assert y.shape == y_ref.shape, "shape mismatch vs reference"
    assert jnp.allclose(y, y_ref, atol=1e-5, rtol=1e-5), "mismatch vs reference"

    # Exercise the general single-K-step path (no accumulator, 2 M tiles).
    m2, k2, n2 = 272, 272, 144
    x2 = jax.random.normal(kx2, (m2, k2), jnp.float32)
    w2 = jax.random.normal(kw2, (n2, k2), jnp.float32) * 0.05
    b2 = jax.random.normal(kb2, (n2,), jnp.float32)
    y2 = _linear_general(x2, w2, b2)
    jax.block_until_ready(y2)
    y2_ref = x2 @ w2.T + b2
    assert jnp.allclose(y2, y2_ref, atol=1e-3, rtol=1e-3), "single-K path mismatch"

    # Exercise the multi-K accumulator path (K > 512 -> tk=128, 5 K steps).
    m3, k3, n3 = 64, 640, 128
    x3 = jax.random.normal(kx3, (m3, k3), jnp.float32)
    w3 = jax.random.normal(kw3, (n3, k3), jnp.float32) * 0.05
    b3 = jax.random.normal(kb3, (n3,), jnp.float32)
    y3 = _linear_general(x3, w3, b3)
    jax.block_until_ready(y3)
    y3_ref = x3 @ w3.T + b3
    assert jnp.allclose(y3, y3_ref, atol=1e-3, rtol=1e-3), "multi-K path mismatch"

    print("KERNEL_OK")
</pallas_src>

<mosaic_0001>
module attributes {stable_mosaic.version = 11 : i64} {
  func.func @_scale_shift_kernel(%arg0: i32, %arg1: memref<1x1xf32, #tpu.memory_space<smem>>, %arg2: memref<1x1xf32, #tpu.memory_space<smem>>, %arg3: memref<8x128xf32, #tpu.memory_space<vmem>>, %arg4: memref<8x128xf32, #tpu.memory_space<vmem>>) attributes {dimension_semantics = [#tpu.dimension_semantics<parallel>], iteration_bounds = array<i64: 1>, scalar_prefetch = 0 : i64, scratch_operands = 0 : i64, tpu.core_type = #tpu.core_type<tc>, window_params = [{transform_indices = @transform_0, window_bounds = array<i64: 1, 1>}, {transform_indices = @transform_1, window_bounds = array<i64: 1, 1>}, {transform_indices = @transform_2, window_bounds = array<i64: 8, 128>}, {transform_indices = @transform_3, window_bounds = array<i64: 8, 128>}]} {
    %c0 = arith.constant 0 : index
    %c0_0 = arith.constant 0 : index
    %0 = memref.load %arg1[%c0, %c0_0] : memref<1x1xf32, #tpu.memory_space<smem>>
    %c0_1 = arith.constant 0 : index
    %c0_2 = arith.constant 0 : index
    %1 = memref.load %arg2[%c0_1, %c0_2] : memref<1x1xf32, #tpu.memory_space<smem>>
    %c0_3 = arith.constant 0 : index
    %c0_4 = arith.constant 0 : index
    %2 = vector.load %arg3[%c0_3, %c0_4] : memref<8x128xf32, #tpu.memory_space<vmem>>, vector<8x128xf32>
    %3 = vector.broadcast %0 : f32 to vector<8x128xf32>
    %4 = arith.mulf %2, %3 : vector<8x128xf32>
    %5 = vector.broadcast %1 : f32 to vector<8x128xf32>
    %6 = arith.addf %4, %5 : vector<8x128xf32>
    %c0_5 = arith.constant 0 : index
    %c0_6 = arith.constant 0 : index
    %7 = vector.load %arg4[%c0_5, %c0_6] : memref<8x128xf32, #tpu.memory_space<vmem>>, vector<8x128xf32>
    tpu.vector_store %arg4[%c0_5, %c0_6], %6 {strides = array<i32>} : memref<8x128xf32, #tpu.memory_space<vmem>>, vector<8x128xf32>,
    return
  }
  func.func @transform_0(%arg0: i32) -> (i32, i32) {
    %c0_i32 = arith.constant 0 : i32
    %c0_i32_0 = arith.constant 0 : i32
    %c0_i32_1 = arith.constant 0 : i32
    return %c0_i32, %c0_i32_0 : i32, i32
  }
  func.func @transform_1(%arg0: i32) -> (i32, i32) {
    %c0_i32 = arith.constant 0 : i32
    %c0_i32_0 = arith.constant 0 : i32
    %c0_i32_1 = arith.constant 0 : i32
    return %c0_i32, %c0_i32_0 : i32, i32
  }
  func.func @transform_2(%arg0: i32) -> (i32, i32) {
    %c0_i32 = arith.constant 0 : i32
    %c0_i32_0 = arith.constant 0 : i32
    return %arg0, %c0_i32 : i32, i32
  }
  func.func @transform_3(%arg0: i32) -> (i32, i32) {
    %c0_i32 = arith.constant 0 : i32
    %c0_i32_0 = arith.constant 0 : i32
    return %arg0, %c0_i32 : i32, i32
  }
}

</mosaic_0001>

<bundles_post_ra>
// kernel: tpu_custom_call.1
= control target key start
LH: loop header
LB: loop body
LE: loop exit
PB: predicated region body
PF: predicated region fallthrough
CT: control target
= control target key end

     0   :  { %10 = vsyncpa [#allocation5], 0  ;;  %s144_s0 = inlined_call_operand.<no memory space> [shape: f32[1,1], index: 0, kind: input, shape index: {}]   ;;  %s145_s1 = inlined_call_operand.<no memory space> [shape: f32[1,1], index: 1, kind: input, shape index: {}]   ;;  %s146_s2 = inlined_call_operand.hbm [shape: f32[8,128], index: 2, kind: input, shape index: {}]   ;;  %s147_s3 = inlined_call_operand.hbm [shape: f32[8,128], index: 3, kind: output, shape index: {}]  }
   0x1   :  { %11 = vsyncpa [#allocation6], 0  ;;  %s21_s14 = sshll.u32 %s146_s2, 4  ;;  %s110_s15 = smov [#allocation4]   ;;  %s22_s14 = int_to_ptr.hbm [resolvable:$true] %s21_s14 }
   0x2   :  { %s23_s16 = sshll.u32 %s110_s15, 4  ;;  %s24_s16 = int_to_ptr.vmem [resolvable:$true] %s23_s16 }
   0x3   :  { %26 = dma.hbm_to_vmem [thread:$0]  %s22_s14, 128, %s24_s16, [#allocation5]  }
   0x4   :  { %106 = dma.done.wait [#allocation5], 128  }
   0x5   :  { %107 = vsyncadd [#allocation5], 4294967168  ;;  %v34_v0 = vstv %s144_s0  ;;  %v33_v1 = vld [vmem:[#allocation4] sm:$0xff]  ;;  %v36_v2 = vstv %s145_s1  ;;  %s111_s21 = smov [#allocation7]   ;;  %s46_s24 = sshll.u32 %s147_s3, 4  ;;  %s47_s24 = int_to_ptr.hbm [resolvable:$true] %s46_s24 }
   0x6   :  { %s44_s22 = sshll.u32 %s111_s21, 4  ;;  %v35_v3 = vmul.f32 %v34_v0, %v33_v1  ;;  %s45_s22 = int_to_ptr.vmem [resolvable:$true] %s44_s22 }
   0x8   :  { %v37_v4 = vadd.f32 %v36_v2, %v35_v3 }
   0xa   :  { %38 = vst [vmem:[#allocation7] sm:$0xff] %v37_v4 }
   0xb   :  { %49 = dma.vmem_to_hbm [thread:$0]  %s45_s22, 128, %s47_s24, [#allocation6]  }
   0xc   :  { %108 = dma.done.wait [#allocation6], 128  }
   0xd   :  { %109 = vsyncadd [#allocation6], 4294967168 }
   0xe   :  { %54 = vsyncpa [#allocation5], 1 }
   0xf   :  { %55 = vsyncpa [#allocation6], 1 }

</bundles_post_ra>
